<compile_context>
chip_gen: v6e
topology: v6e:2x2x1
jax: 0.10.0
libtpu: 0.0.40
codegen_flags: <defaults>
</compile_context>

<pallas_src>
import functools

import jax
import jax.numpy as jnp
from jax import lax
from jax.experimental import pallas as pl
from jax.experimental.pallas import tpu as pltpu


_NEG_SLOPE = 0.01   # PyTorch LeakyReLU default
_BN_EPS = 1e-5      # PyTorch BatchNorm2d default


def _round_up(x, m):
    return (x + m - 1) // m * m


# --------------------------------------------------------------------------
# Kernels
# --------------------------------------------------------------------------

def _accum_taps(x_ref, w_ref, acc_ref, *, n_kw, w_out, sw):
    """Fused-im2col conv accumulation for one (batch, output-row, C-tile) cell.

    x_ref:  (W_in_pad, C_in)   one padded input row selected by the KH grid axis
    w_ref:  (KH*KW, C_in, tile_co) full weight slab for this C_out tile (resident)
    acc_ref: (W_out, tile_co) f32 scratch accumulator across the KH axis
    """
    kh = pl.program_id(3)   # innermost ("arbitrary") reduction axis over kernel rows

    @pl.when(kh == 0)
    def _():
        acc_ref[...] = jnp.zeros_like(acc_ref)

    part = None
    for kw in range(n_kw):                       # static loop over kernel cols
        if sw == 1:
            cols = x_ref[kw:kw + w_out, :]       # (W_out, C_in) contiguous slice
        else:
            cols = x_ref[pl.ds(kw, w_out, stride=sw), :]
        w_slab = w_ref[kh * n_kw + kw]           # (C_in, tile_co), dynamic tap index
        d = lax.dot_general(cols, w_slab, (((1,), (0,)), ((), ())),
                            preferred_element_type=jnp.float32)
        part = d if part is None else part + d
    acc_ref[...] += part


def _conv_apply_kernel(x_ref, w_ref, scale_ref, shift_ref, o_ref, acc_ref, *,
                       n_kh, n_kw, w_out, sw):
    """conv (recomputed, no HBM intermediate) -> y*scale+shift -> LeakyReLU.

    Non-BN path uses scale=1, shift=bias; BN path uses the folded
    (gamma*rsqrt(var+eps), beta - mean*gamma*rsqrt(var+eps)) pair.
    """
    _accum_taps(x_ref, w_ref, acc_ref, n_kw=n_kw, w_out=w_out, sw=sw)

    @pl.when(pl.program_id(3) == n_kh - 1)
    def _():
        y = acc_ref[...] * scale_ref[...] + shift_ref[...]
        o_ref[...] = jnp.where(y >= 0, y, _NEG_SLOPE * y).astype(o_ref.dtype)


def _conv_stats_kernel(x_ref, w_ref, stats_ref, acc_ref, *, n_kh, n_kw, w_out, sw):
    """BN pass 1: fused conv + per-(row, channel-tile) sum / sum-of-squares.

    Conv bias is intentionally omitted: a per-channel constant shifts the mean
    by the same constant and cancels exactly in (x - mean); variance is
    unaffected.  Padded (all-zero) weight channels contribute zero sums.
    """
    _accum_taps(x_ref, w_ref, acc_ref, n_kw=n_kw, w_out=w_out, sw=sw)

    @pl.when(pl.program_id(3) == n_kh - 1)
    def _():
        a = acc_ref[...]
        stats_ref[0:1, :] = jnp.sum(a, axis=0, keepdims=True)       # direct store
        stats_ref[1:2, :] = jnp.sum(a * a, axis=0, keepdims=True)   # direct store


# --------------------------------------------------------------------------
# Wrapper
# --------------------------------------------------------------------------

def cnn_block_forward(x, weight, bias, gamma, beta, *,
                      stride=(1, 1), padding=(1, 1), batch_norm=False,
                      compute_dtype=jnp.bfloat16):
    """CNNBlock forward. x: (N, C_in, H, W) NCHW; weight: (C_out, C_in, KH, KW).

    compute_dtype: dtype of the MXU inputs (bfloat16 by default -- native MXU
    rate on v5e/v6e/v7x); accumulation and the BN / LeakyReLU epilogue are f32.
    """
    if isinstance(stride, int):
        stride = (stride, stride)
    if isinstance(padding, int):
        padding = (padding, padding)
    if compute_dtype is None:
        compute_dtype = x.dtype

    N, C_in, H, W = x.shape
    C_out, _, KH, KW = weight.shape
    sh, sw = stride
    ph, pw = padding
    H_out = (H + 2 * ph - KH) // sh + 1
    W_out = (W + 2 * pw - KW) // sw + 1
    W_in_pad = W + 2 * pw
    out_dtype = x.dtype

    # Lane-dense output channels: multiple of 128 (v5e MXU width); once
    # C_out > 128 pad to 256 so the 256-wide v6e/v7x MXU stays occupied.
    C_pad = _round_up(C_out, 128) if C_out <= 128 else _round_up(C_out, 256)
    tile_co = min(C_pad, 256)
    n_co = C_pad // tile_co

    # --- Single pass over the input: NHWC + zero spatial padding -------------
    # TODO(synk): keep the block NHWC end-to-end (fold these boundary
    # transposes into neighbouring ops) when the surrounding model allows it.
    x_nhwc = jnp.transpose(x, (0, 2, 3, 1))
    x_pad = jnp.pad(x_nhwc, ((0, 0), (ph, ph), (pw, pw), (0, 0)))
    x_pad = x_pad.astype(compute_dtype)

    # weight (O, I, KH, KW) -> (KH*KW, C_in, C_pad): leading axis is the tap id
    # so the kernel grabs its (C_in, tile_co) slab with one dynamic index.
    w_mat = jnp.transpose(weight, (2, 3, 1, 0)).reshape(KH * KW, C_in, C_out)
    w_mat = jnp.pad(w_mat, ((0, 0), (0, 0), (0, C_pad - C_out)))
    w_mat = w_mat.astype(compute_dtype)

    # Grid: batch x output-row x C_out-tile are independent ("parallel",
    # shards across megacore); KH is the accumulated reduction ("arbitrary").
    grid = (N, H_out, n_co, KH)
    x_spec = pl.BlockSpec((None, None, W_in_pad, C_in),
                          lambda n, ho, co, kh: (n, ho * sh + kh, 0, 0))
    w_spec = pl.BlockSpec((KH * KW, C_in, tile_co),
                          lambda n, ho, co, kh: (0, 0, co))
    vec_spec = pl.BlockSpec((1, tile_co), lambda n, ho, co, kh: (0, co))
    o_spec = pl.BlockSpec((None, None, W_out, tile_co),
                          lambda n, ho, co, kh: (n, ho, 0, co))
    stats_spec = pl.BlockSpec((None, None, 2, tile_co),
                              lambda n, ho, co, kh: (n, ho, 0, co))
    acc_scratch = pltpu.VMEM((W_out, tile_co), jnp.float32)
    cparams = pltpu.CompilerParams(
        dimension_semantics=("parallel", "parallel", "parallel", "arbitrary"),
        vmem_limit_bytes=32 * 1024 * 1024)   # > v5e's 16 MiB default, safe on v7x

    static = dict(n_kh=KH, n_kw=KW, w_out=W_out, sw=sw)

    if batch_norm:
        # Pass 1: conv + per-(row, channel-tile) sum / sum-of-squares only
        # (no conv activation is ever written to HBM).
        stats = pl.pallas_call(
            functools.partial(_conv_stats_kernel, **static),
            out_shape=jax.ShapeDtypeStruct((N, H_out, 2, C_pad), jnp.float32),
            grid=grid,
            in_specs=[x_spec, w_spec],
            out_specs=stats_spec,
            scratch_shapes=[acc_scratch],
            compiler_params=cparams,
        )(x_pad, w_mat)

        # Tiny cross-tile reduction + parameter folding in plain JAX.
        m_real = N * H_out * W_out
        ch_sum = jnp.sum(stats[:, :, 0, :], axis=(0, 1))
        ch_sq = jnp.sum(stats[:, :, 1, :], axis=(0, 1))
        mean = ch_sum / m_real
        # Clamp: E[x^2] - mean^2 can go slightly negative from cancellation.
        var = jnp.maximum(ch_sq / m_real - mean * mean, 0.0)   # biased (training BN)
        inv = lax.rsqrt(var + _BN_EPS)
        gamma_p = jnp.pad(gamma.astype(jnp.float32), (0, C_pad - C_out))
        beta_p = jnp.pad(beta.astype(jnp.float32), (0, C_pad - C_out))
        scale = (gamma_p * inv).reshape(1, C_pad)
        shift = (beta_p - mean * gamma_p * inv).reshape(1, C_pad)
    else:
        scale = jnp.ones((1, C_pad), jnp.float32)
        shift = jnp.pad(bias.astype(jnp.float32),
                        (0, C_pad - C_out)).reshape(1, C_pad)

    # Pass 2 (only pass without BN): recompute the conv (cheaper than an HBM
    # round-trip of an f32 intermediate) and fuse FMA + LeakyReLU as epilogue.
    out_nhwc = pl.pallas_call(
        functools.partial(_conv_apply_kernel, **static),
        out_shape=jax.ShapeDtypeStruct((N, H_out, W_out, C_pad), out_dtype),
        grid=grid,
        in_specs=[x_spec, w_spec, vec_spec, vec_spec],
        out_specs=o_spec,
        scratch_shapes=[acc_scratch],
        compiler_params=cparams,
    )(x_pad, w_mat, scale, shift)

    # Slice channel padding; NHWC -> NCHW to match the PyTorch module.
    out = out_nhwc[:, :, :, :C_out]
    return jnp.transpose(out, (0, 3, 1, 2))


# --------------------------------------------------------------------------
# Pure-JAX reference (mirrors the PyTorch module, training-mode BN)
# --------------------------------------------------------------------------

def cnn_block_reference(x, weight, bias, gamma, beta, *,
                        stride, padding, batch_norm,
                        eps=_BN_EPS, negative_slope=_NEG_SLOPE):
    y = lax.conv_general_dilated(
        x, weight, window_strides=stride,
        padding=[(padding[0], padding[0]), (padding[1], padding[1])],
        dimension_numbers=("NCHW", "OIHW", "NCHW"))
    y = y + bias.reshape(1, -1, 1, 1)
    if batch_norm:
        mean = jnp.mean(y, axis=(0, 2, 3), keepdims=True)
        var = jnp.mean(jnp.square(y - mean), axis=(0, 2, 3), keepdims=True)
        y = (y - mean) * lax.rsqrt(var + eps) * gamma.reshape(1, -1, 1, 1) \
            + beta.reshape(1, -1, 1, 1)
    return jnp.where(y >= 0, y, negative_slope * y)


if __name__ == "__main__":
    # Deterministic setup consistent with CNNBlock(4, 8, 3, 1, 1).
    key = jax.random.PRNGKey(0)
    k_x, k_w, k_b = jax.random.split(key, 3)

    N, C_in, H, W = 2, 4, 16, 16
    C_out, KH, KW = 8, 3, 3
    stride = (1, 1)
    padding = (1, 1)

    x = jax.random.normal(k_x, (N, C_in, H, W), dtype=jnp.float32)
    weight = jax.random.normal(k_w, (C_out, C_in, KH, KW), dtype=jnp.float32) * 0.1
    bias = jax.random.normal(k_b, (C_out,), dtype=jnp.float32) * 0.1
    gamma = jnp.ones((C_out,), dtype=jnp.float32)    # BatchNorm2d default init
    beta = jnp.zeros((C_out,), dtype=jnp.float32)

    ok = True

    # float32 MXU inputs: near-exact check against the XLA reference conv.
    for bn in (False, True):
        out = cnn_block_forward(x, weight, bias, gamma, beta,
                                stride=stride, padding=padding, batch_norm=bn,
                                compute_dtype=jnp.float32)
        out = jax.block_until_ready(out)
        ref = cnn_block_reference(x, weight, bias, gamma, beta,
                                  stride=stride, padding=padding, batch_norm=bn)
        ok = ok and bool(jnp.allclose(out, ref, atol=5e-3, rtol=5e-3))

    # bfloat16 MXU inputs (the default): compare against a reference fed the
    # same bf16-rounded inputs so only accumulation/precision details differ.
    x_b = x.astype(jnp.bfloat16).astype(jnp.float32)
    w_b = weight.astype(jnp.bfloat16).astype(jnp.float32)
    for bn in (False, True):
        out = cnn_block_forward(x, weight, bias, gamma, beta,
                                stride=stride, padding=padding, batch_norm=bn)
        out = jax.block_until_ready(out)
        ref = cnn_block_reference(x_b, w_b, bias, gamma, beta,
                                  stride=stride, padding=padding, batch_norm=bn)
        ok = ok and bool(jnp.allclose(out, ref, atol=1e-2, rtol=1e-2))

    print("KERNEL_OK" if ok else "KERNEL_MISMATCH")
</pallas_src>

<mosaic_0001>
module attributes {stable_mosaic.version = 11 : i64} {
  func.func @_conv_apply_kernel(%arg0: i32, %arg1: i32, %arg2: i32, %arg3: i32, %arg4: memref<1x1x18x4xf32, #tpu.memory_space<vmem>>, %arg5: memref<9x4x128xf32, #tpu.memory_space<vmem>>, %arg6: memref<1x128xf32, #tpu.memory_space<vmem>>, %arg7: memref<1x128xf32, #tpu.memory_space<vmem>>, %arg8: memref<1x1x16x128xf32, #tpu.memory_space<vmem>>, %arg9: memref<16x128xf32, #tpu.memory_space<vmem>>) attributes {dimension_semantics = [#tpu.dimension_semantics<parallel>, #tpu.dimension_semantics<parallel>, #tpu.dimension_semantics<parallel>, #tpu.dimension_semantics<arbitrary>], iteration_bounds = array<i64: 2, 16, 1, 3>, scalar_prefetch = 0 : i64, scratch_operands = 1 : i64, tpu.core_type = #tpu.core_type<tc>, window_params = [{transform_indices = @transform_0, window_bounds = array<i64: 1, 1, 18, 4>}, {transform_indices = @transform_1, window_bounds = array<i64: 9, 4, 128>}, {transform_indices = @transform_2, window_bounds = array<i64: 1, 128>}, {transform_indices = @transform_3, window_bounds = array<i64: 1, 128>}, {transform_indices = @transform_4, window_bounds = array<i64: 1, 1, 16, 128>}]} {
    %c0_i32 = arith.constant 0 : i32
    %0 = arith.cmpi eq, %arg3, %c0_i32 : i32
    %1 = arith.extui %0 : i1 to i32
    %c0_i32_0 = arith.constant 0 : i32
    %2 = arith.cmpi ne, %1, %c0_i32_0 : i32
    scf.if %2 {
      %cst_27 = arith.constant 0.000000e+00 : f32
      %35 = vector.broadcast %cst_27 : f32 to vector<16x128xf32>
      %c0_28 = arith.constant 0 : index
      %c0_29 = arith.constant 0 : index
      %36 = vector.load %arg9[%c0_28, %c0_29] : memref<16x128xf32, #tpu.memory_space<vmem>>, vector<16x128xf32>
      tpu.vector_store %arg9[%c0_28, %c0_29], %35 {strides = array<i32>} : memref<16x128xf32, #tpu.memory_space<vmem>>, vector<16x128xf32>,
    } else {
    }
    %c0 = arith.constant 0 : index
    %c0_1 = arith.constant 0 : index
    %c0_2 = arith.constant 0 : index
    %c0_3 = arith.constant 0 : index
    %3 = vector.load %arg4[%c0, %c0_1, %c0_2, %c0_3] : memref<1x1x18x4xf32, #tpu.memory_space<vmem>>, vector<1x1x16x4xf32>
    %4 = vector.shape_cast %3 : vector<1x1x16x4xf32> to vector<16x4xf32>
    %c3_i32 = arith.constant 3 : i32
    %5 = arith.muli %arg3, %c3_i32 : i32
    %c0_i32_4 = arith.constant 0 : i32
    %6 = arith.addi %5, %c0_i32_4 : i32
    %7 = arith.index_cast %6 : i32 to index
    %c0_5 = arith.constant 0 : index
    %c0_6 = arith.constant 0 : index
    %8 = vector.load %arg5[%7, %c0_5, %c0_6] : memref<9x4x128xf32, #tpu.memory_space<vmem>>, vector<1x4x128xf32>
    %9 = vector.shape_cast %8 : vector<1x4x128xf32> to vector<4x128xf32>
    %cst = arith.constant dense<0.000000e+00> : vector<16x128xf32>
    %10 = tpu.matmul %4, %9, %cst {dimension_numbers = #tpu.dot_dimension_numbers<[1], [0], [0], [1], [0, 0, 1, 1], [], []>} : vector<16x4xf32>, vector<4x128xf32>, vector<16x128xf32> -> vector<16x128xf32>
    %c0_7 = arith.constant 0 : index
    %c0_8 = arith.constant 0 : index
    %c1 = arith.constant 1 : index
    %c0_9 = arith.constant 0 : index
    %11 = vector.load %arg4[%c0_7, %c0_8, %c1, %c0_9] : memref<1x1x18x4xf32, #tpu.memory_space<vmem>>, vector<1x1x16x4xf32>
    %12 = vector.shape_cast %11 : vector<1x1x16x4xf32> to vector<16x4xf32>
    %c3_i32_10 = arith.constant 3 : i32
    %13 = arith.muli %arg3, %c3_i32_10 : i32
    %c1_i32 = arith.constant 1 : i32
    %14 = arith.addi %13, %c1_i32 : i32
    %15 = arith.index_cast %14 : i32 to index
    %c0_11 = arith.constant 0 : index
    %c0_12 = arith.constant 0 : index
    %16 = vector.load %arg5[%15, %c0_11, %c0_12] : memref<9x4x128xf32, #tpu.memory_space<vmem>>, vector<1x4x128xf32>
    %17 = vector.shape_cast %16 : vector<1x4x128xf32> to vector<4x128xf32>
    %cst_13 = arith.constant dense<0.000000e+00> : vector<16x128xf32>
    %18 = tpu.matmul %12, %17, %cst_13 {dimension_numbers = #tpu.dot_dimension_numbers<[1], [0], [0], [1], [0, 0, 1, 1], [], []>} : vector<16x4xf32>, vector<4x128xf32>, vector<16x128xf32> -> vector<16x128xf32>
    %19 = arith.addf %10, %18 : vector<16x128xf32>
    %c0_14 = arith.constant 0 : index
    %c0_15 = arith.constant 0 : index
    %c2 = arith.constant 2 : index
    %c0_16 = arith.constant 0 : index
    %20 = vector.load %arg4[%c0_14, %c0_15, %c2, %c0_16] : memref<1x1x18x4xf32, #tpu.memory_space<vmem>>, vector<1x1x16x4xf32>
    %21 = vector.shape_cast %20 : vector<1x1x16x4xf32> to vector<16x4xf32>
    %c3_i32_17 = arith.constant 3 : i32
    %22 = arith.muli %arg3, %c3_i32_17 : i32
    %c2_i32 = arith.constant 2 : i32
    %23 = arith.addi %22, %c2_i32 : i32
    %24 = arith.index_cast %23 : i32 to index
    %c0_18 = arith.constant 0 : index
    %c0_19 = arith.constant 0 : index
    %25 = vector.load %arg5[%24, %c0_18, %c0_19] : memref<9x4x128xf32, #tpu.memory_space<vmem>>, vector<1x4x128xf32>
    %26 = vector.shape_cast %25 : vector<1x4x128xf32> to vector<4x128xf32>
    %cst_20 = arith.constant dense<0.000000e+00> : vector<16x128xf32>
    %27 = tpu.matmul %21, %26, %cst_20 {dimension_numbers = #tpu.dot_dimension_numbers<[1], [0], [0], [1], [0, 0, 1, 1], [], []>} : vector<16x4xf32>, vector<4x128xf32>, vector<16x128xf32> -> vector<16x128xf32>
    %28 = arith.addf %19, %27 : vector<16x128xf32>
    %c0_21 = arith.constant 0 : index
    %c0_22 = arith.constant 0 : index
    %29 = vector.load %arg9[%c0_21, %c0_22] : memref<16x128xf32, #tpu.memory_space<vmem>>, vector<16x128xf32>
    %30 = arith.addf %29, %28 : vector<16x128xf32>
    %c0_23 = arith.constant 0 : index
    %c0_24 = arith.constant 0 : index
    %31 = vector.load %arg9[%c0_23, %c0_24] : memref<16x128xf32, #tpu.memory_space<vmem>>, vector<16x128xf32>
    tpu.vector_store %arg9[%c0_23, %c0_24], %30 {strides = array<i32>} : memref<16x128xf32, #tpu.memory_space<vmem>>, vector<16x128xf32>,
    %c2_i32_25 = arith.constant 2 : i32
    %32 = arith.cmpi eq, %arg3, %c2_i32_25 : i32
    %33 = arith.extui %32 : i1 to i32
    %c0_i32_26 = arith.constant 0 : i32
    %34 = arith.cmpi ne, %33, %c0_i32_26 : i32
    scf.if %34 {
      %c0_27 = arith.constant 0 : index
      %c0_28 = arith.constant 0 : index
      %35 = vector.load %arg9[%c0_27, %c0_28] : memref<16x128xf32, #tpu.memory_space<vmem>>, vector<16x128xf32>
      %c0_29 = arith.constant 0 : index
      %c0_30 = arith.constant 0 : index
      %36 = vector.load %arg6[%c0_29, %c0_30] : memref<1x128xf32, #tpu.memory_space<vmem>>, vector<1x128xf32>
      %37 = vector.broadcast %36 : vector<1x128xf32> to vector<16x128xf32>
      %38 = arith.mulf %35, %37 : vector<16x128xf32>
      %c0_31 = arith.constant 0 : index
      %c0_32 = arith.constant 0 : index
      %39 = vector.load %arg7[%c0_31, %c0_32] : memref<1x128xf32, #tpu.memory_space<vmem>>, vector<1x128xf32>
      %40 = vector.broadcast %39 : vector<1x128xf32> to vector<16x128xf32>
      %41 = arith.addf %38, %40 : vector<16x128xf32>
      %cst_33 = arith.constant 0.000000e+00 : f32
      %42 = vector.broadcast %cst_33 : f32 to vector<16x128xf32>
      %43 = arith.cmpf oge, %41, %42 : vector<16x128xf32>
      %cst_34 = arith.constant 0.00999999977 : f32
      %44 = vector.broadcast %cst_34 : f32 to vector<16x128xf32>
      %45 = arith.mulf %44, %41 : vector<16x128xf32>
      %46 = arith.select %43, %41, %45 : vector<16x128xi1>, vector<16x128xf32>
      %c0_35 = arith.constant 0 : index
      %c0_36 = arith.constant 0 : index
      %c0_37 = arith.constant 0 : index
      %c0_38 = arith.constant 0 : index
      %47 = vector.load %arg8[%c0_35, %c0_36, %c0_37, %c0_38] : memref<1x1x16x128xf32, #tpu.memory_space<vmem>>, vector<1x1x16x128xf32>
      %48 = vector.shape_cast %47 : vector<1x1x16x128xf32> to vector<16x128xf32>
      %49 = vector.shape_cast %46 : vector<16x128xf32> to vector<1x1x16x128xf32>
      tpu.vector_store %arg8[%c0_35, %c0_36, %c0_37, %c0_38], %49 {strides = array<i32>} : memref<1x1x16x128xf32, #tpu.memory_space<vmem>>, vector<1x1x16x128xf32>,
    } else {
    }
    return
  }
  func.func @transform_0(%arg0: i32, %arg1: i32, %arg2: i32, %arg3: i32) -> (i32, i32, i32, i32) {
    %c1_i32 = arith.constant 1 : i32
    %0 = arith.muli %arg1, %c1_i32 : i32
    %1 = arith.addi %0, %arg3 : i32
    %c0_i32 = arith.constant 0 : i32
    %c0_i32_0 = arith.constant 0 : i32
    %c0_i32_1 = arith.constant 0 : i32
    return %arg0, %1, %c0_i32, %c0_i32_0 : i32, i32, i32, i32
  }
  func.func @transform_1(%arg0: i32, %arg1: i32, %arg2: i32, %arg3: i32) -> (i32, i32, i32) {
    %c0_i32 = arith.constant 0 : i32
    %c0_i32_0 = arith.constant 0 : i32
    %c0_i32_1 = arith.constant 0 : i32
    return %c0_i32, %c0_i32_0, %arg2 : i32, i32, i32
  }
  func.func @transform_2(%arg0: i32, %arg1: i32, %arg2: i32, %arg3: i32) -> (i32, i32) {
    %c0_i32 = arith.constant 0 : i32
    %c0_i32_0 = arith.constant 0 : i32
    return %c0_i32, %arg2 : i32, i32
  }
  func.func @transform_3(%arg0: i32, %arg1: i32, %arg2: i32, %arg3: i32) -> (i32, i32) {
    %c0_i32 = arith.constant 0 : i32
    %c0_i32_0 = arith.constant 0 : i32
    return %c0_i32, %arg2 : i32, i32
  }
  func.func @transform_4(%arg0: i32, %arg1: i32, %arg2: i32, %arg3: i32) -> (i32, i32, i32, i32) {
    %c0_i32 = arith.constant 0 : i32
    %c0_i32_0 = arith.constant 0 : i32
    return %arg0, %arg1, %c0_i32, %arg2 : i32, i32, i32, i32
  }
}

</mosaic_0001>

<bundles_post_ra>
// kernel: tpu_custom_call.1
= control target key start
LH: loop header
LB: loop body
LE: loop exit
PB: predicated region body
PF: predicated region fallthrough
CT: control target
= control target key end

     0   :  { %9 = vsyncpa [#allocation4], 0  ;;  %s1252_s0 = inlined_call_operand.vmem [shape: f32[2,18,18,4], index: 0, kind: input, shape index: {}]   ;;  %s1253_s1 = inlined_call_operand.vmem [shape: f32[9,4,128], index: 1, kind: input, shape index: {}]   ;;  %s1254_s2 = inlined_call_operand.vmem [shape: f32[1,128], index: 2, kind: input, shape index: {}]   ;;  %s1255_s3 = inlined_call_operand.vmem [shape: f32[1,128], index: 3, kind: input, shape index: {}]   ;;  %s1256_s4 = inlined_call_operand.hbm [shape: f32[2,16,16,128], index: 4, kind: output, shape index: {}]  }
   0x1   :  { %11 = vsyncpa [#allocation4 + $0x1], 0  ;;  %s1060_s15 = smov 0   ;;  %s1062_s16 = smov 0  }
   0x2   :  { %s1064_s17 = smov 0   ;;  %s1066_s18 = smov 0  }
   0x3   :  { %s1068_s19 = smov 0   ;;  %s1070_s20 = smov 0  }
   0x4   :  { %s1072_s21 = smov 0   ;;  %s1074_s22 = smov 0  }
   0x5   :  { %s1076_s23 = smov 0   ;;  %s1078_s24 = smov 0  }
   0x6 LB: > { %s771_s25 = sadd.s32 4294967295, %s1029_s24   ;;  %s772_s26 = sadd.s32 4294967294, %s1029_s24   ;;  %s1029_s24 = sphi %s1078_s24, %s17_s24   ;;  %s1025_s23 = sphi %s1076_s23, %s1275_s23   ;;  %s1021_s22 = sphi %s1074_s22, %s1274_s22   ;;  %s1017_s21 = sphi %s1072_s21, %s1273_s21   ;;  %s1013_s20 = sphi %s1070_s20, %s1272_s20   ;;  %s1009_s19 = sphi %s1068_s19, %s1271_s19   ;;  %s1005_s18 = sphi %s1066_s18, %s1270_s18   ;;  %s1001_s17 = sphi %s1064_s17, %s1269_s17   ;;  %s997_s16 = sphi %s1062_s16, %s1268_s16   ;;  %s993_s15 = sphi %s1060_s15, %s1267_s15  }
   0x7   : > { %s32_s27 = sadd.s32 1, %s1017_s21  ;;  %s39_s28 = sadd.s32 1, %s1021_s22 }
   0x8   : > { %p33_p0 = scmp.ge.s32.totalorder %s32_s27, 3  ;;  %s43_s29 = sadd.s32 1, %s1025_s23 }
   0x9   : > { %p172_p1 = scmp.ne.s32.totalorder %s1001_s17, %s997_s16  ;;  %p173_p2 = scmp.eq.s32.totalorder %s771_s25, 95 }
   0xa   : > { %s1277_s27 = smov (%p33_p0, %s32_s27), 0  ;;  %s1279_s28 = smov (!%p33_p0, %s39_s28), %s1021_s22 }
   0xb   : > { %p178_p3 = scmp.ne.s32.totalorder %s997_s16, %s993_s15  ;;  %p41_p4 = scmp.ge.s32.totalorder %s1279_s28, 16 }
   0xc   : > { %p179_p5 = scmp.eq.s32.totalorder %s772_s26, 95  ;;  %p1122_p6 = por %p173_p2, %p172_p1 }
   0xd   : > { %s1281_s28 = smov (%p41_p4, %s1279_s28), 0  ;;  %s1283_s29 = smov (!%p41_p4, %s43_s29), %s1025_s23 }
   0xe   : > { %1261 = sst [smem:[#allocation6_spill]] %s1281_s28  ;;  %p1129_p7 = por %p179_p5, %p178_p3 }
   0xf   : > { %p778_p8 = scmp.ge.s32.totalorder %s1029_s24, 1  ;;  %p45_p9 = scmp.ge.s32.totalorder %s1283_s29, 2 }
  0x10   : > { %p230_p10 = scmp.lt.s32.totalorder %s1029_s24, 97  ;;  %s156_s6 = ssub.s32 %s1021_s22, %s1281_s28 }
  0x11   : > { %s1285_s29 = smov (%p45_p9, %s1283_s29), 0  ;;  %s162_s9 = sadd.s32 1, %s1001_s17 }
  0x12   : > { %1263 = sst [smem:[#allocation7_spill]] %s1285_s29  ;;  %p231_p11 = pnand %p778_p8, %p230_p10 }
  0x13   : > { %s155_s7 = ssub.s32 %s1025_s23, %s1285_s29  ;;  %s1259_s11 = sand.u32 (!%p231_p11), 1, %s997_s16  }
  0x14   : > { %s157_s8 = sor.u32 %s156_s6, %s155_s7  ;;  %234 = sbr.rel (%p231_p11) target bundleno = 287 (0x11f), region = 36 }
  0x15   : > { %p160_p12 = scmp.eq.s32.totalorder %s157_s8, 0  ;;  %s271_s12 = sadd.s32 (!%p231_p11), %s1005_s18, %s1009_s19 }
  0x16   : > { %s779_s13 = sshll.u32 (!%p231_p11), %s1259_s11, 4  ;;  %p272_p13 = scmp.lt.s32.totalorder (!%p231_p11), %s1013_s20, 1 }
  0x17   : > { %s1143_s10 = scalar_select %p160_p12, %s1001_s17, %s162_s9  }
  0x18   : > { %p274_p0 = scmp.lt.s32.totalorder (!%p231_p11), %s271_s12, 17  ;;  %s1155_s28 = scalar_lea.vmem (!%p231_p11), [#allocation3], %s779_s13 }
  0x19   : > { %s273_s14 = scalar_select %p272_p13, %s1013_s20, 1 }
  0x1a   : > { %s1287_s12 = smov (!%p274_p0, %s271_s12), 17  ;;  %p781_p1 = scmp.ne.s32.totalorder %s1005_s18, 0 }
  0x1b   : > { %s830_s25 = smul.u32 54, %s273_s14 }
  0x1c   : > { %s829_s26 = smul.u32 3, %s1287_s12 }
  0x1d   : > { %295 = sbr.rel (%p781_p1) target bundleno = 36 (0x24), region = 40 }
  0x1e   : > { %s278_s6 = sadd.s32 %s830_s25, %s829_s26 }
  0x1f   : > { %s780_s7 = sshll.u32 %s278_s6, 3 }
  0x20   : > { %s280_s29 = scalar_lea.vmem %s1252_s0, %s780_s7 }
  0x22   : > { %v1031_v0 = vmov 0.0  }
  0x23   : > { %296 = vst [vmem:[#allocation2] sm:$0xff] %v1031_v0  ;;  %297 = vst [vmem:[#allocation2 + $0x8] sm:$0xff] %v1031_v0 }
  0x24 PF: > { %s782_s11 = smul.u32 12, %s1005_s18  ;;  %v304_v1 = vld [vmem:[%s280_s29 + $0x1] sm:$0xff]  ;;  %vm310_vm0 = vcmask 31744   ;;  %vm317_vm1 = vcmask 1043456   ;;  %v305_v3 = vld [vmem:[%s280_s29 + $0x9] sm:$0xff]  ;;  %p796_p2 = scmp.ne.s32.totalorder %s1005_s18, 2 }
  0x25   : > { %v298_v2 = vld [vmem:[%s280_s29] sm:$0xff]  ;;  %816 = vmatprep.mubr.msk.f32.mxu0 %vm310_vm0, %v304_v1  ;;  %v299_v6 = vld [vmem:[%s280_s29 + $0x8] sm:$0xff] }
  0x26   : > { %821 = vmatprep.mubr.msk.f32.mxu1 %vm310_vm0, %v298_v2  ;;  %s302_s14 = scalar_lea.vmem %s1253_s1, %s782_s11  ;;  %v480_v8 = vld [vmem:[%s280_s29 + $0x2] sm:$0xff]  ;;  %v481_v9 = vld [vmem:[%s280_s29 + $0xa] sm:$0xff] }
  0x27   : > { %v784_v4 = vld [vmem:[%s302_s14 + $0x4] sm:$0xf]  ;;  %v303_v5 = vld [vmem:[%s302_s14] sm:$0xf]  ;;  %v792_v7 = vld [vmem:[%s302_s14 + $0x8] sm:$0xf] }
  0x28   : > { %814 = vmatprep.subr.msk.mxu0 %vm317_vm1, %v784_v4  ;;  %819 = vmatprep.subr.msk.mxu1 %vm317_vm1, %v303_v5 }
  0x29   : > { %815 = vmatpush3.msk.msra.mxu0 %vm317_vm1, %v784_v4  ;;  %820 = vmatpush3.msk.msra.mxu1 %vm317_vm1, %v303_v5 }
  0x2a   : > { %817 = vmatmul.mubr.msk.f32.vlgmr.msra.gmra.mxu0 %vm310_vm0, %v305_v3  ;;  %822 = vmatmul.mubr.msk.f32.vlgmr.msra.gmra.mxu1 %vm310_vm0, %v299_v6  ;;  %v573_v16 = vld [vmem:[#allocation2 + $0x8] sm:$0xff]  ;;  %v572_v20 = vld [vmem:[#allocation2] sm:$0xff] }
  0x2b   : > { %824 = vmatprep.subr.msk.mxu0 %vm317_vm1, %v792_v7  ;;  %826 = vmatprep.mubr.msk.f32.mxu0 %vm310_vm0, %v480_v8 }
  0x2c   : > { %825 = vmatpush3.msk.msra.mxu0 %vm317_vm1, %v792_v7 }
  0x2e   : > { %827 = vmatmul.mubr.msk.f32.vlgmr.msra.gmra.mxu0 %vm310_vm0, %v481_v9 }
  0xea   : > { %v818_v10 = vpop.f32.mrf.mxu0  ;;  %v823_v11 = vpop.f32.mrf.mxu1 }
  0xeb   : > { %v477_v14 = vadd.f32 %v823_v11, %v818_v10 }
  0xec   : > { %v387_v12 = vpop.f32.mrf.mxu0  ;;  %v471_v13 = vpop.f32.mrf.mxu1 }
  0xed   : > { %v472_v17 = vadd.f32 %v471_v13, %v387_v12 }
  0xee   : > { %v828_v15 = vpop.f32.mrf.mxu0 }
  0xef   : > { %v571_v18 = vadd.f32 %v828_v15, %v477_v14 }
  0xf0   : > { %v561_v19 = vpop.f32.mrf.mxu0 }
  0xf1   : > { %v575_v21 = vadd.f32 %v573_v16, %v571_v18  ;;  %v570_v22 = vadd.f32 %v561_v19, %v472_v17  ;;  %581 = sbr.rel (%p796_p2) target bundleno = 261 (0x105), region = 44 }
  0xf3   : > { %577 = vst [vmem:[#allocation2 + $0x8] sm:$0xff] %v575_v21  ;;  %v574_v23 = vadd.f32 %v572_v20, %v570_v22 }
  0xf5   : > { %576 = vst [vmem:[#allocation2] sm:$0xff] %v574_v23 }
  0xf6   : > { %v797_v25 = vld [vmem:[%s1254_s2] ss:$0 sm:$0xff] }
  0xf7   : > { %v798_v26 = vld [vmem:[%s1255_s3] ss:$0 sm:$0xff] }
  0xfa   : > { %v583_v28 = vld [vmem:[#allocation2 + $0x8] sm:$0xff] }
  0xfb   : > { %v592_v29 = vmul.f32 %v797_v25, %v583_v28 }
  0xfc   : > { %v582_v24 = vld [vmem:[#allocation2] sm:$0xff] }
  0xfd   : > { %v591_v27 = vmul.f32 %v797_v25, %v582_v24  ;;  %v601_v31 = vadd.f32 %v798_v26, %v592_v29 }
  0xff   : > { %v600_v30 = vadd.f32 %v798_v26, %v591_v27  ;;  %vm603_vm3 = vcmp.ge.f32.partialorder %v601_v31, 0.0  ;;  %v605_v33 = vmul.f32 0.01, %v601_v31 }
 0x101   : > { %vm602_vm2 = vcmp.ge.f32.partialorder %v600_v30, 0.0  ;;  %v604_v32 = vmul.f32 0.01, %v600_v30  ;;  %v607_v35 = vsel %vm603_vm3, %v601_v31, %v605_v33 }
 0x102   : > { %609 = vst [vmem:[%s1155_s28 + $0x8] sm:$0xff] %v607_v35 }
 0x103   : > { %v606_v34 = vsel %vm602_vm2, %v600_v30, %v604_v32 }
 0x104   : > { %608 = vst [vmem:[%s1155_s28] sm:$0xff] %v606_v34 }
 0x105 PF: > { %s800_s18 = sshll.u32 %s1009_s19, 1  ;;  %s801_s6 = sshll.u32 %s1013_s20, 5 }
 0x106   : > { %s627_s7 = sshll.u32 %s1155_s28, 4  ;;  %s624_s8 = sadd.s32 %s801_s6, %s800_s18  ;;  %s1186_s7 = int_to_ptr.vmem [resolvable:$true] %s627_s7 }
 0x107   : > { %s802_s9 = sshll.u32 %s624_s8, 7  ;;  %s1264_s29 = sand.u32 1, %s997_s16  }
 0x108   : > { %s1191_s14 = scalar_lea.hbm %s1256_s4, %s802_s9  ;;  %s1195_s11 = scalar_lea.sflag [#allocation4], %s1264_s29 }
 0x109   : > { %s921_s25 = scalar_lea.vmem %s1186_s7, 256  ;;  %s1032_s19 = smov [#allocation3]  }
 0x10a   : > { %p922_p3 = scmp.ne.s32.totalorder %s1186_s7, %s921_s25  ;;  %s925_s20 = sshll.u32 %s1032_s19, 4  ;;  %s926_s20 = int_to_ptr.vmem [resolvable:$false] %s925_s20 }
 0x10b   : > { %s927_s28 = scalar_lea.vmem %s926_s20, 512  ;;  %p928_p8 = scmp.lt.s32.totalorder %s1186_s7, %s926_s20 }
 0x10c   : > { %p923_p4 = pnand %p922_p3, %p1122_p6  ;;  %p929_p9 = scmp.lt.s32.totalorder %s927_s28, %s921_s25 }
 0x10e   : > { %p924_p5 = pneg %p923_p4  ;;  %p930_p10 = por %p929_p9, %p928_p8 }
 0x110   : > { %p931_p11 = pnand %p930_p10, %p924_p5 }
 0x112   : > { %934 = shalt.err (!%p931_p11)
}
 0x113   : > { %s935_s26 = scalar_lea.hbm %s1191_s14, 256  ;;  %s939_s8 = scalar_lea.hbm %s1256_s4, 8192 }
 0x114   : > { %p936_p12 = scmp.ne.s32.totalorder %s1191_s14, %s935_s26  ;;  %p940_p1 = scmp.lt.s32.totalorder %s1191_s14, %s1256_s4 }
 0x115   : > { %p941_p2 = scmp.lt.s32.totalorder %s939_s8, %s935_s26 }
 0x116   : > { %p937_p13 = pnand %p936_p12, %p1122_p6 }
 0x117   : > { %p942_p3 = por %p941_p2, %p940_p1 }
 0x118   : > { %p938_p0 = pneg %p937_p13 }
 0x11a   : > { %p943_p4 = pnand %p942_p3, %p938_p0 }
 0x11c   : > { %946 = shalt.err (!%p943_p4)
}
 0x11d   : > { %s1033_s13 = smov 128   ;;  %s1034_s29 = smov 8  }
 0x11e   : > { %831 = dma.vmem_to_hbm [thread:$0]  (%p1122_p6), %s1186_s7, 256, %s1191_s14, %s1195_s11, %s1033_s13, %s1033_s13, %s1034_s29  }
 0x11f PF: > { %p837_p5 = scmp.ge.s32.totalorder %s1029_s24, 2  ;;  %s642_s25 = sand.u32 1, %s993_s15  }
 0x120   : > { %s643_s19 = scalar_lea.sflag [#allocation4], %s642_s25 }
 0x121   : > { %p834_p8 = pnand %p837_p5, %p1129_p7 }
 0x123   : > { %p835_p9 = pneg %p834_p8 }
 0x125   : > { %988 = dma.done.wait (%p835_p9), %s643_s19, 256  }
 0x126   : > { %990 = vsyncadd (%p835_p9), %s643_s19, 4294967040  ;;  %s17_s24 = sadd.s32 1, %s1029_s24   ;;  %s1265_s30 = sld [smem:[#allocation6_spill]] }
 0x127   : > { %p14_p10 = scmp.ge.s32.totalorder %s17_s24, 98   ;;  %s1266_s7 = sld [smem:[#allocation7_spill]] }
 0x128   : > { %s1267_s15 = smov %s997_s16  ;;  %s1268_s16 = smov %s1001_s17 }
 0x129   : > { %s1269_s17 = smov %s1143_s10  ;;  %s1270_s18 = smov %s1017_s21 }
 0x12a   : > { %s1271_s19 = smov %s1021_s22  ;;  %s1272_s20 = smov %s1025_s23 }
 0x12b   : > { %s1273_s21 = smov %s1277_s27  ;;  %16 = sbr.rel (!%p14_p10) target bundleno = 6 (0x6), region = 91 }
 0x12c   : > { %s1274_s22 = smov %s1265_s30 }
 0x12d   : > { %s1275_s23 = smov %s1266_s7 }
 0x130   :  { %648 = vsyncpa [#allocation4], 1 }
 0x131   :  { %650 = vsyncpa [#allocation4 + $0x1], 1 }

</bundles_post_ra>
